<compile_context>
chip_gen: v7x
topology: tpu7x:2x2x1
jax: 0.10.0
libtpu: 0.0.40
codegen_flags: <defaults>
</compile_context>

<pallas_src>
import jax
import jax.numpy as jnp
from jax import lax
from jax.experimental import pallas as pl
from jax.experimental.pallas import tpu as pltpu


_DMA_DEPTH = 4  # in-flight DMA window (3-4 keeps the copy queue non-empty)


# --------------------------------------------------------------------------
# DMA-only path: HBM -> HBM strided copies of the kept region, in-kernel loop.
# --------------------------------------------------------------------------
def _make_chomp_dma_kernel(tb: int, full: int, rem: int, l_out: int):
    """tb/full/rem/l_out are static Python ints baked into the kernel."""

    def kernel(x_hbm, o_hbm, sem):
        def full_copy(c, slot):
            b0 = c * tb
            return pltpu.make_async_copy(
                x_hbm.at[pl.ds(b0, tb), :, pl.ds(0, l_out)],
                o_hbm.at[pl.ds(b0, tb), :, pl.ds(0, l_out)],
                sem.at[slot],
            )

        def rem_copy():
            b0 = full * tb
            return pltpu.make_async_copy(
                x_hbm.at[pl.ds(b0, rem), :, pl.ds(0, l_out)],
                o_hbm.at[pl.ds(b0, rem), :, pl.ds(0, l_out)],
                sem.at[_DMA_DEPTH],
            )

        # Start the ragged remainder chunk first so it overlaps the main loop.
        if rem:
            rem_copy().start()

        # Prologue: fill the in-flight window (static, at most _DMA_DEPTH).
        for i in range(min(_DMA_DEPTH, full)):
            full_copy(i, i).start()

        # Steady state: retire chunk (i - DEPTH), reuse its slot for chunk i.
        # All full chunks have identical size, so the waited descriptor always
        # matches the started one (semaphore byte-accounting stays in sync).
        if full > _DMA_DEPTH:
            def steady(i, carry):
                slot = i % _DMA_DEPTH
                full_copy(i - _DMA_DEPTH, slot).wait()
                full_copy(i, slot).start()
                return carry

            lax.fori_loop(_DMA_DEPTH, full, steady, 0)

        # Drain the tail of the window (static, at most _DMA_DEPTH waits).
        for i in range(max(full - _DMA_DEPTH, 0), full):
            full_copy(i, i % _DMA_DEPTH).wait()

        if rem:
            rem_copy().wait()

    return kernel


def _chomp1d_dma(x: jax.Array, l_out: int, target_chunk_bytes: int) -> jax.Array:
    n, c, _ = x.shape
    itemsize = x.dtype.itemsize
    per_batch_bytes = c * l_out * itemsize
    # Batch-chunk size: big DMA bursts; no VMEM is used so the only cap is N.
    tb = max(1, min(n, target_chunk_bytes // max(1, per_batch_bytes)))
    full = n // tb
    rem = n - full * tb

    return pl.pallas_call(
        _make_chomp_dma_kernel(tb, full, rem, l_out),
        out_shape=jax.ShapeDtypeStruct((n, c, l_out), x.dtype),
        grid_spec=pltpu.PrefetchScalarGridSpec(
            num_scalar_prefetch=0,
            grid=(1,),                                     # single step: loop in-kernel
            in_specs=[pl.BlockSpec(memory_space=pl.ANY)],  # raw HBM ref
            out_specs=pl.BlockSpec(memory_space=pl.ANY),   # written via DMA
            scratch_shapes=[pltpu.SemaphoreType.DMA((_DMA_DEPTH + 1,))],
        ),
        compiler_params=pltpu.CompilerParams(
            dimension_semantics=("arbitrary",),
            has_side_effects=True,
        ),
        cost_estimate=pl.CostEstimate(
            flops=0,
            transcendentals=0,
            bytes_accessed=2 * n * c * l_out * itemsize,
        ),
    )(x)


# --------------------------------------------------------------------------
# VMEM fallback for short rows: contiguous full-row reads, lane-dense writes.
# --------------------------------------------------------------------------
def _chomp_vmem_kernel(x_ref, o_ref):
    # Read the full (tb, C, L) block (contiguous HBM reads), write the full
    # (tb, C, l_out) output block (lane-dense: l_out is the full last dim).
    o_ref[...] = x_ref[:, :, : o_ref.shape[2]]


def _chomp1d_vmem(x: jax.Array, l_out: int,
                  target_block_bytes: int = 2 * 1024 * 1024) -> jax.Array:
    n, c, l = x.shape
    itemsize = x.dtype.itemsize
    per_batch_bytes = c * l * itemsize
    tb = max(1, min(n, target_block_bytes // max(1, per_batch_bytes)))
    grid = (pl.cdiv(n, tb),)

    return pl.pallas_call(
        _chomp_vmem_kernel,
        out_shape=jax.ShapeDtypeStruct((n, c, l_out), x.dtype),
        grid_spec=pltpu.PrefetchScalarGridSpec(
            num_scalar_prefetch=0,
            grid=grid,
            in_specs=[pl.BlockSpec((tb, c, l), lambda i: (i, 0, 0))],
            out_specs=pl.BlockSpec((tb, c, l_out), lambda i: (i, 0, 0)),
        ),
        compiler_params=pltpu.CompilerParams(
            dimension_semantics=("parallel",),
        ),
        cost_estimate=pl.CostEstimate(
            flops=0,
            transcendentals=0,
            bytes_accessed=(n * c * l + n * c * l_out) * itemsize,
        ),
    )(x)


# --------------------------------------------------------------------------
# Public entry point: Chomp1d.forward
# --------------------------------------------------------------------------
def chomp1d(x: jax.Array, chomp_size: int, *,
            target_chunk_bytes: int = 16 * 1024 * 1024,
            min_dma_row_bytes: int = 512) -> jax.Array:
    """Pallas TPU implementation of Chomp1d.forward for x of shape (N, C, L)."""
    if chomp_size <= 0:
        return x

    n, c, l = x.shape
    l_out = l - chomp_size
    if l_out <= 0:
        raise ValueError("chomp_size must be smaller than the sequence length")

    # Short kept rows make strided HBM->HBM DMAs descriptor-bound; use the
    # BlockSpec-pipelined VMEM copy instead.
    if l_out * x.dtype.itemsize < min_dma_row_bytes:
        return _chomp1d_vmem(x, l_out)
    return _chomp1d_dma(x, l_out, target_chunk_bytes)


if __name__ == "__main__":
    key = jax.random.PRNGKey(0)
    k0, k1, k2 = jax.random.split(key, 3)

    # Case 1 — module-typical small shape (N, C, L) = (2, 4, 16), chomp 3.
    # Rows are short -> VMEM fallback path.
    N, C, L = 2, 4, 16
    chomp = 3
    x = jax.random.normal(k0, (N, C, L), dtype=jnp.float32)
    y = jax.block_until_ready(chomp1d(x, chomp))
    assert y.shape == (N, C, L - chomp), y.shape
    assert jnp.array_equal(y, x[:, :, :-chomp]), "VMEM path mismatch"

    # chomp_size == 0 identity path.
    y0 = jax.block_until_ready(chomp1d(x, 0))
    assert jnp.array_equal(y0, x)

    # Case 2 — rows wide enough for the DMA path; small chunk target so the
    # prologue + drain + ragged remainder logic is exercised (full <= depth).
    N2, C2, L2, chomp2 = 5, 8, 160, 16
    row_bytes2 = C2 * (L2 - chomp2) * 4
    x2 = jax.random.normal(k1, (N2, C2, L2), dtype=jnp.float32)
    y2 = jax.block_until_ready(
        chomp1d(x2, chomp2, target_chunk_bytes=2 * row_bytes2))
    assert jnp.array_equal(y2, x2[:, :, :-chomp2]), "DMA path (short) mismatch"

    # Case 3 — enough chunks that the steady-state wait/start loop runs
    # (full > _DMA_DEPTH) plus a ragged remainder chunk.
    N3 = 13
    x3 = jax.random.normal(k2, (N3, C2, L2), dtype=jnp.float32)
    y3 = jax.block_until_ready(
        chomp1d(x3, chomp2, target_chunk_bytes=2 * row_bytes2))
    assert jnp.array_equal(y3, x3[:, :, :-chomp2]), "DMA path (steady) mismatch"

    print("KERNEL_OK")
</pallas_src>

<mosaic_0001>
module attributes {stable_mosaic.version = 11 : i64} {
  func.func @_chomp_vmem_kernel(%arg0: i32, %arg1: memref<2x4x16xf32, #tpu.memory_space<vmem>>, %arg2: memref<2x4x13xf32, #tpu.memory_space<vmem>>) attributes {dimension_semantics = [#tpu.dimension_semantics<parallel>], iteration_bounds = array<i64: 1>, scalar_prefetch = 0 : i64, scratch_operands = 0 : i64, tpu.core_type = #tpu.core_type<tc>, window_params = [{transform_indices = @transform_0, window_bounds = array<i64: 2, 4, 16>}, {transform_indices = @transform_1, window_bounds = array<i64: 2, 4, 13>}]} {
    %c0 = arith.constant 0 : index
    %c0_0 = arith.constant 0 : index
    %c0_1 = arith.constant 0 : index
    %0 = vector.load %arg1[%c0, %c0_0, %c0_1] : memref<2x4x16xf32, #tpu.memory_space<vmem>>, vector<2x4x13xf32>
    %c0_2 = arith.constant 0 : index
    %c0_3 = arith.constant 0 : index
    %c0_4 = arith.constant 0 : index
    %1 = vector.load %arg2[%c0_2, %c0_3, %c0_4] : memref<2x4x13xf32, #tpu.memory_space<vmem>>, vector<2x4x13xf32>
    tpu.vector_store %arg2[%c0_2, %c0_3, %c0_4], %0 {strides = array<i32>} : memref<2x4x13xf32, #tpu.memory_space<vmem>>, vector<2x4x13xf32>,
    return
  }
  func.func @transform_0(%arg0: i32) -> (i32, i32, i32) {
    %c0_i32 = arith.constant 0 : i32
    %c0_i32_0 = arith.constant 0 : i32
    %c0_i32_1 = arith.constant 0 : i32
    return %arg0, %c0_i32, %c0_i32_0 : i32, i32, i32
  }
  func.func @transform_1(%arg0: i32) -> (i32, i32, i32) {
    %c0_i32 = arith.constant 0 : i32
    %c0_i32_0 = arith.constant 0 : i32
    %c0_i32_1 = arith.constant 0 : i32
    return %arg0, %c0_i32, %c0_i32_0 : i32, i32, i32
  }
}

</mosaic_0001>

<bundles_post_ra>
// kernel: tpu_custom_call.1
= control target key start
LH: loop header
LB: loop body
LE: loop exit
PB: predicated region body
PF: predicated region fallthrough
CT: control target
= control target key end

     0   :  { %6 = vsyncpa [#allocation3], 0  ;;  %s135_s0 = inlined_call_operand.hbm [shape: f32[2,4,16], index: 0, kind: input, shape index: {}]   ;;  %s136_s1 = inlined_call_operand.hbm [shape: f32[2,4,13], index: 1, kind: output, shape index: {}]  }
   0x1   :  { %7 = vsyncpa [#allocation4], 0  ;;  %s97_s6 = smov [#allocation2]   ;;  %s49_s10 = scalar_lea.hbm %s135_s0, 128 }
   0x2   :  { %s13_s7 = sshll.u32 %s97_s6, 4  ;;  %p50_p0 = scmp.ne.s32.totalorder %s135_s0, %s49_s10  ;;  %s14_s7 = int_to_ptr.vmem [resolvable:$true] %s13_s7 }
   0x3   :  { %p53_p1 = scmp.lt.u32.totalorder %s49_s10, %s135_s0 }
   0x5   :  { %p55_p2 = pnand %p53_p1, %p50_p0 }
   0x7   :  { %58 = shalt.err (!%p55_p2)
}
   0x8   :  { %s59_s15 = scalar_lea.vmem %s14_s7, 128  ;;  %p64_p4 = scmp.lt.s32.totalorder %s14_s7, %s14_s7 }
   0x9   :  { %p60_p3 = scmp.ne.s32.totalorder %s14_s7, %s59_s15  ;;  %p65_p5 = scmp.lt.s32.totalorder %s59_s15, %s59_s15 }
   0xb   :  { %p66_p6 = por %p65_p5, %p64_p4 }
   0xd   :  { %p67_p7 = pnand %p66_p6, %p60_p3 }
   0xf   :  { %70 = shalt.err (!%p67_p7)
}
  0x10   :  { %s98_s16 = smov 64   ;;  %s99_s17 = smov 4  }
  0x11   :  { %19 = dma.hbm_to_vmem [thread:$0]  %s135_s0, 128, %s14_s7, [#allocation3], %s98_s16, %s98_s16, %s99_s17  }
  0x12   :  { %93 = dma.done.wait [#allocation3], 128  }
  0x13   :  { %94 = vsyncadd [#allocation3], 4294967168  ;;  %s100_s20 = smov [#allocation5]   ;;  %vm25_vm0 = vcmask 101376   ;;  %v23_v0 = vld [vmem:[#allocation2] sm:$0xf] }
  0x14   :  { %s33_s21 = sshll.u32 %s100_s20, 4  ;;  %v24_v1 = vld [vmem:[#allocation2 + $0x4] sm:$0xf]  ;;  %26 = vst.msk [vmem:[#allocation5] sm:$0xf] %vm25_vm0, %v23_v0  ;;  %s34_s21 = int_to_ptr.vmem [resolvable:$true] %s33_s21 }
  0x15   :  { %27 = vst.msk [vmem:[#allocation5 + $0x4] sm:$0xf] %vm25_vm0, %v24_v1  ;;  %s71_s22 = scalar_lea.vmem %s34_s21, 128  ;;  %p76_p9 = scmp.lt.s32.totalorder %s34_s21, %s34_s21 }
  0x16   :  { %p72_p8 = scmp.ne.s32.totalorder %s34_s21, %s71_s22  ;;  %p77_p10 = scmp.lt.s32.totalorder %s71_s22, %s71_s22 }
  0x18   :  { %p78_p11 = por %p77_p10, %p76_p9 }
  0x1a   :  { %p79_p12 = pnand %p78_p11, %p72_p8 }
  0x1c   :  { %82 = shalt.err (!%p79_p12)
}
  0x1d   :  { %s83_s0 = scalar_lea.hbm %s136_s1, 128 }
  0x1e   :  { %p84_p13 = scmp.ne.s32.totalorder %s136_s1, %s83_s0  ;;  %p87_p0 = scmp.lt.u32.totalorder %s83_s0, %s136_s1 }
  0x20   :  { %p89_p1 = pnand %p87_p0, %p84_p13 }
  0x22   :  { %92 = shalt.err (!%p89_p1)
}
  0x23   :  { %39 = dma.vmem_to_hbm [thread:$0]  %s34_s21, 128, %s136_s1, [#allocation4], %s98_s16, %s98_s16, %s99_s17  }
  0x24   :  { %95 = dma.done.wait [#allocation4], 128  }
  0x25   :  { %96 = vsyncadd [#allocation4], 4294967168 }
  0x26   :  { %43 = vsyncpa [#allocation3], 1 }
  0x27   :  { %44 = vsyncpa [#allocation4], 1 }

</bundles_post_ra>
